<compile_context>
chip_gen: v6e
topology: v6e:2x2x1
jax: 0.10.0
libtpu: 0.0.40
codegen_flags: <defaults>
</compile_context>

<pallas_src>
import functools

import jax
import jax.numpy as jnp
from jax import lax
from jax.experimental import pallas as pl
from jax.experimental.pallas import tpu as pltpu

LANES = 128
TARGET_BLOCK_BYTES = 6 * 1024 * 1024  # logits bytes per grid step (v7x-safe, sweepable)


def _focal_ce_kernel(x_ref, t_ref, out_ref, acc_ref, *, gamma, num_classes,
                     n_valid, block_rows, need_tail_mask):
    j = pl.program_id(1)
    last_j = pl.num_programs(1) - 1

    @pl.when(j == 0)
    def _init():
        acc_ref[...] = jnp.zeros_like(acc_ref)

    C = num_classes
    t = t_ref[0]                                     # (block_rows, 128) int32

    if C <= 32:
        # Small class count (detection/segmentation heads): fully unrolled
        # elementwise chains over dense (block_rows, 128) tiles — VPU/EUP only.
        xs = [x_ref[0, c].astype(jnp.float32) for c in range(C)]

        x_max = xs[0]
        for c in range(1, C):
            x_max = jnp.maximum(x_max, xs[c])

        x_tgt = jnp.where(t == 0, xs[0], 0.0)
        for c in range(1, C):
            x_tgt = jnp.where(t == c, xs[c], x_tgt)

        sum_exp = jnp.exp(xs[0] - x_max)
        for c in range(1, C):
            sum_exp = sum_exp + jnp.exp(xs[c] - x_max)
    else:
        # Large class count: reduce over the leading axis of the dense
        # (C, block_rows, 128) tile (still elementwise across sublanes/lanes).
        x3 = x_ref[0].astype(jnp.float32)            # (C, block_rows, 128)
        x_max = jnp.max(x3, axis=0)
        cls = lax.broadcasted_iota(jnp.int32, x3.shape, 0)
        x_tgt = jnp.sum(jnp.where(cls == t[None], x3, 0.0), axis=0)
        sum_exp = jnp.sum(jnp.exp(x3 - x_max[None]), axis=0)

    # Numerically stable softmax cross entropy: ce = logsumexp(x) - x[target]
    ce = x_max + jnp.log(sum_exp) - x_tgt            # (block_rows, 128)

    pt = jnp.exp(-ce)
    one_m = 1.0 - pt
    g = float(gamma)
    if g == 2.0:                 # default: avoid pow (2 extra EUP ops / elem)
        w = one_m * one_m
    elif g == 1.0:
        w = one_m
    elif g == 0.0:
        w = jnp.ones_like(one_m)
    else:
        # ce can round to a tiny negative -> one_m < 0 -> NaN from fractional pow.
        w = jnp.power(jnp.maximum(one_m, 0.0), g)
    focal = w * ce

    if need_tail_mask:
        @pl.when(j != last_j)
        def _acc_interior():
            acc_ref[...] += focal

        @pl.when(j == last_j)
        def _acc_tail():
            # Mask the ragged tail of the last block only.  Keep this a select
            # (not a multiply mask): OOB tail data may produce inf/NaN.
            row = lax.broadcasted_iota(jnp.int32, focal.shape, 0)
            lane = lax.broadcasted_iota(jnp.int32, focal.shape, 1)
            idx = (j * block_rows + row) * LANES + lane
            acc_ref[...] += jnp.where(idx < n_valid, focal, 0.0)
    else:
        acc_ref[...] += focal

    @pl.when(j == last_j)
    def _finalize():
        out_ref[...] = jnp.reshape(jnp.sum(acc_ref[...]), (1, 1, 1))


def focal_multilabel_loss(inputs, targets, gamma=2.0):
    """loss = mean((1 - exp(-ce))**gamma * ce), ce = softmax cross entropy.

    inputs:  (N, C, *spatial) float logits
    targets: (N, *spatial) integer class indices in [0, C)
    """
    N, C = inputs.shape[0], inputs.shape[1]
    spatial = inputs.shape[2:]
    assert targets.shape == (N,) + spatial, (inputs.shape, targets.shape)

    hw = 1
    for s in spatial:
        hw *= s
    hw128 = pl.cdiv(hw, LANES) * LANES

    x = inputs.reshape(N, C, hw)
    t = targets.reshape(N, hw)
    if t.dtype != jnp.int32:
        t = t.astype(jnp.int32)
    if hw128 != hw:
        # Pad at most 127 columns so the lane-dense reshape below is legal; the
        # padded tail is dropped by the in-kernel mask.  (No pad for aligned HW.)
        x = jnp.pad(x, ((0, 0), (0, 0), (0, hw128 - hw)))
        t = jnp.pad(t, ((0, 0), (0, hw128 - hw)))

    rows = hw128 // LANES
    x = x.reshape(N, C, rows, LANES)   # contiguous view, no HBM copy
    t = t.reshape(N, rows, LANES)

    # Big sublane+lane dense blocks (~TARGET_BLOCK_BYTES of logits per step).
    itemsize = jnp.dtype(inputs.dtype).itemsize
    bytes_per_row = C * LANES * itemsize
    max_rows = max(8, (TARGET_BLOCK_BYTES // bytes_per_row) // 8 * 8)
    if rows <= max_rows:
        block_rows = rows              # full extent (ok even if not multiple of 8)
        num_j = 1
    else:
        block_rows = max_rows          # multiple of 8; last block may be partial
        num_j = pl.cdiv(rows, block_rows)

    need_tail_mask = (num_j * block_rows * LANES) != hw

    kernel = functools.partial(
        _focal_ce_kernel,
        gamma=float(gamma),
        num_classes=int(C),
        n_valid=int(hw),
        block_rows=int(block_rows),
        need_tail_mask=bool(need_tail_mask),
    )

    # VMEM budget: double-buffered x + t blocks plus the dense accumulator,
    # with 2x headroom; safe on v5e/v6e (128 MiB) and v7x (64 MiB).
    x_block_bytes = C * block_rows * LANES * itemsize
    t_block_bytes = block_rows * LANES * 4
    acc_bytes = block_rows * LANES * 4
    vmem_limit = int(min(max(2 * (2 * (x_block_bytes + t_block_bytes) + acc_bytes),
                             16 * 1024 * 1024), 64 * 1024 * 1024))

    cost = pl.CostEstimate(
        flops=int(N * hw * (4 * C + 8)),
        transcendentals=int(N * hw * (C + 3)),
        bytes_accessed=int(x.size * itemsize + t.size * 4 + N * 4),
    )

    partial_sums = pl.pallas_call(
        kernel,
        out_shape=jax.ShapeDtypeStruct((N, 1, 1), jnp.float32),
        grid_spec=pltpu.PrefetchScalarGridSpec(
            num_scalar_prefetch=0,
            grid=(N, num_j),
            in_specs=[
                pl.BlockSpec((1, C, block_rows, LANES), lambda n, j: (n, 0, j, 0)),
                pl.BlockSpec((1, block_rows, LANES), lambda n, j: (n, j, 0)),
            ],
            out_specs=pl.BlockSpec((1, 1, 1), lambda n, j: (n, 0, 0)),
            scratch_shapes=[pltpu.VMEM((block_rows, LANES), jnp.float32)],
        ),
        compiler_params=pltpu.CompilerParams(
            dimension_semantics=("parallel", "arbitrary"),
            vmem_limit_bytes=vmem_limit,
        ),
        cost_estimate=cost,
    )(x, t)

    total = jnp.sum(partial_sums)
    return total / jnp.float32(N * hw)


def _reference_focal_ce(inputs, targets, gamma=2.0):
    x = inputs.astype(jnp.float32)
    logz = jax.nn.logsumexp(x, axis=1, keepdims=True)
    logp = x - logz
    tgt = targets.astype(jnp.int32)[:, None, ...]
    ce = -jnp.take_along_axis(logp, tgt, axis=1)[:, 0, ...]
    pt = jnp.exp(-ce)
    return jnp.mean((1.0 - pt) ** gamma * ce)


if __name__ == "__main__":
    key = jax.random.PRNGKey(0)
    k1, k2 = jax.random.split(key)
    # Detection-head-style logits: batch=2, classes=4, 16x16 spatial.
    x = jax.random.normal(k1, (2, 4, 16, 16), dtype=jnp.float32)
    targets = jax.random.randint(k2, (2, 16, 16), 0, 4, dtype=jnp.int32)

    out = focal_multilabel_loss(x, targets, gamma=2.0)
    out = jax.block_until_ready(out)

    ref = _reference_focal_ce(x, targets, gamma=2.0)
    assert jnp.allclose(out, ref, rtol=1e-5, atol=1e-6), (out, ref)

    print("KERNEL_OK")
</pallas_src>

<mosaic_0001>
module attributes {stable_mosaic.version = 11 : i64} {
  func.func @_focal_ce_kernel(%arg0: i32, %arg1: i32, %arg2: memref<1x4x2x128xf32, #tpu.memory_space<vmem>>, %arg3: memref<1x2x128xi32, #tpu.memory_space<vmem>>, %arg4: memref<1x1x1xf32, #tpu.memory_space<vmem>>, %arg5: memref<2x128xf32, #tpu.memory_space<vmem>>) attributes {dimension_semantics = [#tpu.dimension_semantics<parallel>, #tpu.dimension_semantics<arbitrary>], iteration_bounds = array<i64: 2, 1>, scalar_prefetch = 0 : i64, scratch_operands = 1 : i64, tpu.core_type = #tpu.core_type<tc>, window_params = [{transform_indices = @transform_0, window_bounds = array<i64: 1, 4, 2, 128>}, {transform_indices = @transform_1, window_bounds = array<i64: 1, 2, 128>}, {transform_indices = @transform_2, window_bounds = array<i64: 1, 1, 1>}]} {
    %c0_i32 = arith.constant 0 : i32
    %0 = arith.cmpi eq, %arg1, %c0_i32 : i32
    %1 = arith.extui %0 : i1 to i32
    %c0_i32_0 = arith.constant 0 : i32
    %2 = arith.cmpi ne, %1, %c0_i32_0 : i32
    scf.if %2 {
      %cst_25 = arith.constant 0.000000e+00 : f32
      %56 = vector.broadcast %cst_25 : f32 to vector<2x128xf32>
      %c0_26 = arith.constant 0 : index
      %c0_27 = arith.constant 0 : index
      %57 = vector.load %arg5[%c0_26, %c0_27] : memref<2x128xf32, #tpu.memory_space<vmem>>, vector<2x128xf32>
      tpu.vector_store %arg5[%c0_26, %c0_27], %56 {strides = array<i32>} : memref<2x128xf32, #tpu.memory_space<vmem>>, vector<2x128xf32>,
    } else {
    }
    %c0 = arith.constant 0 : index
    %c0_1 = arith.constant 0 : index
    %c0_2 = arith.constant 0 : index
    %3 = vector.load %arg3[%c0, %c0_1, %c0_2] : memref<1x2x128xi32, #tpu.memory_space<vmem>>, vector<1x2x128xi32>
    %4 = vector.shape_cast %3 : vector<1x2x128xi32> to vector<2x128xi32>
    %c0_3 = arith.constant 0 : index
    %c0_4 = arith.constant 0 : index
    %c0_5 = arith.constant 0 : index
    %c0_6 = arith.constant 0 : index
    %5 = vector.load %arg2[%c0_3, %c0_4, %c0_5, %c0_6] : memref<1x4x2x128xf32, #tpu.memory_space<vmem>>, vector<1x1x2x128xf32>
    %6 = vector.shape_cast %5 : vector<1x1x2x128xf32> to vector<2x128xf32>
    %c0_7 = arith.constant 0 : index
    %c1 = arith.constant 1 : index
    %c0_8 = arith.constant 0 : index
    %c0_9 = arith.constant 0 : index
    %7 = vector.load %arg2[%c0_7, %c1, %c0_8, %c0_9] : memref<1x4x2x128xf32, #tpu.memory_space<vmem>>, vector<1x1x2x128xf32>
    %8 = vector.shape_cast %7 : vector<1x1x2x128xf32> to vector<2x128xf32>
    %c0_10 = arith.constant 0 : index
    %c2 = arith.constant 2 : index
    %c0_11 = arith.constant 0 : index
    %c0_12 = arith.constant 0 : index
    %9 = vector.load %arg2[%c0_10, %c2, %c0_11, %c0_12] : memref<1x4x2x128xf32, #tpu.memory_space<vmem>>, vector<1x1x2x128xf32>
    %10 = vector.shape_cast %9 : vector<1x1x2x128xf32> to vector<2x128xf32>
    %c0_13 = arith.constant 0 : index
    %c3 = arith.constant 3 : index
    %c0_14 = arith.constant 0 : index
    %c0_15 = arith.constant 0 : index
    %11 = vector.load %arg2[%c0_13, %c3, %c0_14, %c0_15] : memref<1x4x2x128xf32, #tpu.memory_space<vmem>>, vector<1x1x2x128xf32>
    %12 = vector.shape_cast %11 : vector<1x1x2x128xf32> to vector<2x128xf32>
    %13 = arith.maximumf %6, %8 : vector<2x128xf32>
    %14 = arith.maximumf %13, %10 : vector<2x128xf32>
    %15 = arith.maximumf %14, %12 : vector<2x128xf32>
    %c0_i32_16 = arith.constant 0 : i32
    %16 = vector.broadcast %c0_i32_16 : i32 to vector<2x128xi32>
    %17 = arith.cmpi eq, %4, %16 : vector<2x128xi32>
    %cst = arith.constant 0.000000e+00 : f32
    %18 = vector.broadcast %cst : f32 to vector<2x128xf32>
    %19 = arith.select %17, %6, %18 : vector<2x128xi1>, vector<2x128xf32>
    %c1_i32 = arith.constant 1 : i32
    %20 = vector.broadcast %c1_i32 : i32 to vector<2x128xi32>
    %21 = arith.cmpi eq, %4, %20 : vector<2x128xi32>
    %22 = arith.select %21, %8, %19 : vector<2x128xi1>, vector<2x128xf32>
    %c2_i32 = arith.constant 2 : i32
    %23 = vector.broadcast %c2_i32 : i32 to vector<2x128xi32>
    %24 = arith.cmpi eq, %4, %23 : vector<2x128xi32>
    %25 = arith.select %24, %10, %22 : vector<2x128xi1>, vector<2x128xf32>
    %c3_i32 = arith.constant 3 : i32
    %26 = vector.broadcast %c3_i32 : i32 to vector<2x128xi32>
    %27 = arith.cmpi eq, %4, %26 : vector<2x128xi32>
    %28 = arith.select %27, %12, %25 : vector<2x128xi1>, vector<2x128xf32>
    %29 = arith.subf %6, %15 : vector<2x128xf32>
    %30 = math.exp %29 : vector<2x128xf32>
    %31 = arith.subf %8, %15 : vector<2x128xf32>
    %32 = math.exp %31 : vector<2x128xf32>
    %33 = arith.addf %30, %32 : vector<2x128xf32>
    %34 = arith.subf %10, %15 : vector<2x128xf32>
    %35 = math.exp %34 : vector<2x128xf32>
    %36 = arith.addf %33, %35 : vector<2x128xf32>
    %37 = arith.subf %12, %15 : vector<2x128xf32>
    %38 = math.exp %37 : vector<2x128xf32>
    %39 = arith.addf %36, %38 : vector<2x128xf32>
    %40 = math.log %39 : vector<2x128xf32>
    %41 = arith.addf %15, %40 : vector<2x128xf32>
    %42 = arith.subf %41, %28 : vector<2x128xf32>
    %cst_17 = arith.constant 0.000000e+00 : f32
    %43 = vector.broadcast %cst_17 : f32 to vector<2x128xf32>
    %44 = arith.subf %43, %42 : vector<2x128xf32>
    %45 = math.exp %44 : vector<2x128xf32>
    %cst_18 = arith.constant 1.000000e+00 : f32
    %46 = vector.broadcast %cst_18 : f32 to vector<2x128xf32>
    %47 = arith.subf %46, %45 : vector<2x128xf32>
    %48 = arith.mulf %47, %47 : vector<2x128xf32>
    %49 = arith.mulf %48, %42 : vector<2x128xf32>
    %c0_19 = arith.constant 0 : index
    %c0_20 = arith.constant 0 : index
    %50 = vector.load %arg5[%c0_19, %c0_20] : memref<2x128xf32, #tpu.memory_space<vmem>>, vector<2x128xf32>
    %51 = arith.addf %50, %49 : vector<2x128xf32>
    %c0_21 = arith.constant 0 : index
    %c0_22 = arith.constant 0 : index
    %52 = vector.load %arg5[%c0_21, %c0_22] : memref<2x128xf32, #tpu.memory_space<vmem>>, vector<2x128xf32>
    tpu.vector_store %arg5[%c0_21, %c0_22], %51 {strides = array<i32>} : memref<2x128xf32, #tpu.memory_space<vmem>>, vector<2x128xf32>,
    %c0_i32_23 = arith.constant 0 : i32
    %53 = arith.cmpi eq, %arg1, %c0_i32_23 : i32
    %54 = arith.extui %53 : i1 to i32
    %c0_i32_24 = arith.constant 0 : i32
    %55 = arith.cmpi ne, %54, %c0_i32_24 : i32
    scf.if %55 {
      %c0_25 = arith.constant 0 : index
      %c0_26 = arith.constant 0 : index
      %56 = vector.load %arg5[%c0_25, %c0_26] : memref<2x128xf32, #tpu.memory_space<vmem>>, vector<2x128xf32>
      %57 = vector.shape_cast %56 : vector<2x128xf32> to vector<1x2x128xf32>
      %cst_27 = arith.constant dense<0.000000e+00> : vector<1xf32>
      %58 = vector.multi_reduction <add>, %57, %cst_27 [1, 2] : vector<1x2x128xf32> to vector<1xf32>
      %59 = vector.shape_cast %58 : vector<1xf32> to vector<1x1x1xf32>
      %60 = vector.extract %59[0, 0, 0] : f32 from vector<1x1x1xf32>
      %61 = vector.broadcast %60 : f32 to vector<1x1x1xf32>
      %c0_28 = arith.constant 0 : index
      %c0_29 = arith.constant 0 : index
      %c0_30 = arith.constant 0 : index
      %62 = vector.load %arg4[%c0_28, %c0_29, %c0_30] : memref<1x1x1xf32, #tpu.memory_space<vmem>>, vector<1x1x1xf32>
      tpu.vector_store %arg4[%c0_28, %c0_29, %c0_30], %61 {strides = array<i32>} : memref<1x1x1xf32, #tpu.memory_space<vmem>>, vector<1x1x1xf32>,
    } else {
    }
    return
  }
  func.func @transform_0(%arg0: i32, %arg1: i32) -> (i32, i32, i32, i32) {
    %c0_i32 = arith.constant 0 : i32
    %c0_i32_0 = arith.constant 0 : i32
    %c0_i32_1 = arith.constant 0 : i32
    return %arg0, %c0_i32, %arg1, %c0_i32_0 : i32, i32, i32, i32
  }
  func.func @transform_1(%arg0: i32, %arg1: i32) -> (i32, i32, i32) {
    %c0_i32 = arith.constant 0 : i32
    %c0_i32_0 = arith.constant 0 : i32
    return %arg0, %arg1, %c0_i32 : i32, i32, i32
  }
  func.func @transform_2(%arg0: i32, %arg1: i32) -> (i32, i32, i32) {
    %c0_i32 = arith.constant 0 : i32
    %c0_i32_0 = arith.constant 0 : i32
    %c0_i32_1 = arith.constant 0 : i32
    return %arg0, %c0_i32, %c0_i32_0 : i32, i32, i32
  }
}

</mosaic_0001>

<bundles_post_ra>
// kernel: tpu_custom_call.1
= control target key start
LH: loop header
LB: loop body
LE: loop exit
PB: predicated region body
PF: predicated region fallthrough
CT: control target
= control target key end

     0   :  { %7 = vsyncpa [#allocation4], 0  ;;  %s732_s0 = inlined_call_operand.hbm [shape: f32[2,4,2,128], index: 0, kind: input, shape index: {}]   ;;  %s733_s1 = inlined_call_operand.hbm [shape: s32[2,2,128], index: 1, kind: input, shape index: {}]   ;;  %s734_s2 = inlined_call_operand.vmem [shape: f32[2,1,1], index: 2, kind: output, shape index: {}]  }
   0x1   :  { %9 = vsyncpa [#allocation4 + $0x1], 0 }
   0x2   :  { %10 = vsyncpa [#allocation6], 0 }
   0x3   :  { %12 = vsyncpa [#allocation6 + $0x1], 0  ;;  %s605_s9 = smov 0   ;;  %s607_s10 = smov 0  }
   0x4   :  { %s609_s11 = smov 0   ;;  %s611_s12 = smov 0  }
   0x5   :  { %s613_s13 = smov 0   ;;  %s615_s14 = smov 0  }
   0x6 LB: > { %s378_s15 = sadd.s32 4294967295, %s583_s14   ;;  %s30_s16 = sadd.s32 1, %s579_s13  ;;  %s583_s14 = sphi %s615_s14, %s18_s14   ;;  %s579_s13 = sphi %s613_s13, %s743_s13   ;;  %s575_s12 = sphi %s611_s12, %s742_s12   ;;  %s571_s11 = sphi %s609_s11, %s741_s11   ;;  %s567_s10 = sphi %s607_s10, %s740_s10   ;;  %s563_s9 = sphi %s605_s9, %s739_s9  }
   0x7   : > { %p32_p0 = scmp.ge.s32.totalorder %s30_s16, 2  ;;  %s39_s17 = sadd.s32 1, %s571_s11 }
   0x8   : > { %p46_p1 = scmp.ne.s32.totalorder %s571_s11, %s567_s10  ;;  %p47_p2 = scmp.eq.s32.totalorder %s583_s14, 0 }
   0x9   : > { %s745_s16 = smov (%p32_p0, %s30_s16), 0  ;;  %p52_p4 = scmp.ne.s32.totalorder %s567_s10, %s563_s9 }
   0xa   : > { %p641_p3 = por %p47_p2, %p46_p1  ;;  %s34_s19 = ssub.s32 %s579_s13, %s745_s16 }
   0xb   : > { %p53_p5 = scmp.eq.s32.totalorder %s378_s15, 0  ;;  %p37_p6 = scmp.eq.s32.totalorder %s34_s19, 0 }
   0xc   : > { %p409_p8 = scmp.lt.s32.totalorder %s583_s14, 2  ;;  %s657_s22 = sand.u32 1, %s571_s11  }
   0xd   : > { %p648_p7 = por %p53_p5, %p52_p4  ;;  %s395_s23 = sshll.u32 %s579_s13, 7 }
   0xe   : > { %s654_s21 = scalar_select %p37_p6, %s571_s11, %s39_s17  }
   0xf   : > { %s382_s24 = sshll.u32 %s657_s22, 3  ;;  %s141_s27 = scalar_lea.hbm %s732_s0, %s395_s23 }
  0x10   : > { %s134_s28 = scalar_lea.vmem [#allocation3], %s382_s24  ;;  %p666_p9 = pnand %p409_p8, %p641_p3 }
  0x11   : > { %s142_s29 = sshll.u32 %s134_s28, 4  ;;  %s131_s3 = scalar_lea.sflag [#allocation4], %s657_s22  ;;  %s143_s29 = int_to_ptr.vmem [resolvable:$true] %s142_s29 }
  0x12   : > { %p475_p10 = pneg %p666_p9  ;;  %s486_s4 = scalar_lea.vmem %s143_s29, 128 }
  0x13   : > { %p487_p11 = scmp.ne.s32.totalorder %s143_s29, %s486_s4  ;;  %s585_s5 = smov [#allocation3]  }
  0x14   : > { %s491_s6 = sshll.u32 %s585_s5, 4  ;;  %s492_s6 = int_to_ptr.vmem [resolvable:$false] %s491_s6 }
  0x15   : > { %p489_p12 = pnand %p487_p11, %p475_p10  ;;  %s493_s7 = scalar_lea.vmem %s492_s6, 256 }
  0x16   : > { %p494_p0 = scmp.lt.s32.totalorder %s143_s29, %s492_s6  ;;  %p495_p1 = scmp.lt.s32.totalorder %s493_s7, %s486_s4 }
  0x17   : > { %p490_p13 = pneg %p489_p12 }
  0x18   : > { %p496_p2 = por %p495_p1, %p494_p0 }
  0x1a   : > { %p497_p3 = pnand %p496_p2, %p490_p13 }
  0x1c   : > { %500 = shalt.err (!%p497_p3)
}
  0x1d   : > { %s586_s8 = smov 32   ;;  %s587_s9 = smov 2  }
  0x1e   : > { %405 = dma.hbm_to_vmem [thread:$0]  (!%p666_p9), %s141_s27, 128, %s143_s29, %s131_s3, %s586_s8, %s586_s8, %s587_s9  }
  0x1f   : > { %p387_p4 = scmp.ge.s32.totalorder %s583_s14, 1  ;;  %p169_p5 = scmp.lt.s32.totalorder %s583_s14, 3 }
  0x20   : > { %s385_s15 = sshll.u32 %s657_s22, 1  ;;  %s386_s18 = sshll.u32 %s579_s13, 5 }
  0x21   : > { %p681_p6 = pnand %p387_p4, %p169_p5  ;;  %s156_s19 = scalar_lea.vmem [#allocation5], %s385_s15 }
  0x22   : > { %s164_s23 = sshll.u32 %s156_s19, 4  ;;  %s162_s26 = scalar_lea.hbm %s733_s1, %s386_s18  ;;  %s165_s23 = int_to_ptr.vmem [resolvable:$true] %s164_s23 }
  0x23   : > { %s153_s28 = scalar_lea.sflag [#allocation6], %s657_s22  ;;  %s514_s4 = scalar_lea.vmem %s165_s23, 32 }
  0x24   : > { %p515_p8 = scmp.ne.s32.totalorder %s165_s23, %s514_s4  ;;  %s588_s27 = smov [#allocation5]  }
  0x25   : > { %s519_s29 = sshll.u32 %s588_s27, 4  ;;  %s520_s29 = int_to_ptr.vmem [resolvable:$false] %s519_s29 }
  0x26   : > { %p517_p11 = pnand %p515_p8, %p475_p10  ;;  %s521_s3 = scalar_lea.vmem %s520_s29, 64 }
  0x27   : > { %p522_p13 = scmp.lt.s32.totalorder %s165_s23, %s520_s29  ;;  %p523_p0 = scmp.lt.s32.totalorder %s521_s3, %s514_s4 }
  0x28   : > { %p518_p12 = pneg %p517_p11 }
  0x29   : > { %p524_p1 = por %p523_p0, %p522_p13 }
  0x2b   : > { %p525_p2 = pnand %p524_p1, %p518_p12 }
  0x2d   : > { %528 = shalt.err (!%p525_p2)
}
  0x2e   : > { %408 = dma.hbm_to_vmem [thread:$0]  (!%p666_p9), %s162_s26, 32, %s165_s23, %s153_s28  }
  0x2f   : > { %173 = sbr.rel (%p681_p6) target bundleno = 345 (0x159), region = 28  ;;  %s175_s22 = sand.u32 (!%p681_p6), 1, %s567_s10  }
  0x30   : > { %s388_s5 = sshll.u32 (!%p681_p6), %s175_s22, 3  ;;  %s176_s6 = scalar_lea.sflag (!%p681_p6), [#allocation4], %s175_s22 }
  0x31   : > { %s179_s7 = scalar_lea.vmem (!%p681_p6), [#allocation3], %s388_s5 }
  0x34   : > { %554 = dma.done.wait (%p648_p7), %s176_s6, 128  }
  0x35   : > { %556 = vsyncadd (%p648_p7), %s176_s6, 4294967168  ;;  %s389_s8 = sshll.u32 %s175_s22, 1  ;;  %s185_s9 = scalar_lea.sflag [#allocation6], %s175_s22 }
  0x36   : > { %s702_s15 = scalar_lea.vmem [#allocation5], %s389_s8 }
  0x37   : > { %558 = dma.done.wait (%p648_p7), %s185_s9, 32  }
  0x38   : > { %560 = vsyncadd (%p648_p7), %s185_s9, 4294967264  ;;  %v589_v0 = vmov 0.0   ;;  %v221_v1 = vld [vmem:[%s179_s7] sm:$0x3]  ;;  %v390_v2 = vld [vmem:[%s179_s7 + $0x2] sm:$0x3] }
  0x39   : > { %219 = vst [vmem:[#allocation2] sm:$0x3] %v589_v0  ;;  %v391_v3 = vld [vmem:[%s179_s7 + $0x4] sm:$0x3]  ;;  %v228_v4 = vmax.f32 %v221_v1, %v390_v2  ;;  %v392_v5 = vld [vmem:[%s179_s7 + $0x6] sm:$0x3] }
  0x3a   : > { %v220_v23 = vld [vmem:[%s702_s15] sm:$0x3]  ;;  %vm271_vm4 = vcmask 1041408   ;;  %p212_p7 = scmp.lt.s32.totalorder %s575_s12, 1  ;;  %vm283_vm5 = vcmask 0  }
  0x3b   : > { %v229_v6 = vmax.f32 %v228_v4, %v391_v3  ;;  %vm231_vm0 = vcmp.eq.s32.totalorder %v220_v23, 0  ;;  %vm233_vm1 = vcmp.eq.s32.totalorder %v220_v23, 1  ;;  %vm235_vm2 = vcmp.eq.s32.totalorder %v220_v23, 2 }
  0x3c   : > { %v232_v24 = vsel %vm231_vm0, %v221_v1, 0.0  ;;  %vm237_vm3 = vcmp.eq.s32.totalorder %v220_v23, 3  ;;  %s747_s12 = smov (!%p212_p7, %s575_s12), 1 }
  0x3d   : > { %v230_v7 = vmax.f32 %v229_v6, %v392_v5  ;;  %v234_v25 = vsel %vm233_vm1, %v390_v2, %v232_v24  ;;  %s214_s17 = scalar_lea.vmem %s734_s2, %s747_s12 }
  0x3e   : > { %v236_v26 = vsel %vm235_vm2, %v391_v3, %v234_v25 }
  0x3f   : > { %v239_v8 = vsub.f32 %v221_v1, %v230_v7  ;;  %v242_v9 = vsub.f32 %v390_v2, %v230_v7  ;;  %v246_v10 = vsub.f32 %v391_v3, %v230_v7  ;;  %v250_v11 = vsub.f32 %v392_v5, %v230_v7 }
  0x40   : > { %v238_v29 = vsel %vm237_vm3, %v392_v5, %v236_v26  ;;  %v264_v37 = vld [vmem:[#allocation2] sm:$0x3] }
  0x41   : > { %v240_v12 = vmul.f32 1.442695, %v239_v8  ;;  %v243_v13 = vmul.f32 1.442695, %v242_v9  ;;  %v247_v14 = vmul.f32 1.442695, %v246_v10 }
  0x42   : > { %v251_v15 = vmul.f32 1.442695, %v250_v11 }
  0x43   : > { %461 = vpow2.f32 %v240_v12 }
  0x44   : > { %463 = vpow2.f32 %v243_v13 }
  0x45   : > { %465 = vpow2.f32 %v247_v14 }
  0x46   : > { %467 = vpow2.f32 %v251_v15 }
  0x50   : > { %v462_v16 = vpop.eup %461 }
  0x51   : > { %v464_v17 = vpop.eup %463 }
  0x52   : > { %v466_v18 = vpop.eup %465  ;;  %v245_v19 = vadd.f32 %v464_v17, %v462_v16 }
  0x53   : > { %v468_v20 = vpop.eup %467 }
  0x54   : > { %v249_v21 = vadd.f32 %v466_v18, %v245_v19 }
  0x56   : > { %v253_v22 = vadd.f32 %v468_v20, %v249_v21 }
  0x58   : > { %469 = vlog2.f32 %v253_v22 }
  0x65   : > { %v470_v27 = vpop.eup %469 }
  0x66   : > { %v255_v28 = vmul.f32 0.6931472, %v470_v27 }
  0x68   : > { %v256_v30 = vadd.f32 %v255_v28, %v230_v7 }
  0x6a   : > { %v257_v31 = vsub.f32 %v256_v30, %v238_v29 }
  0x6c   : > { %v258_v32 = vsub.f32 0.0, %v257_v31 }
  0x6e   : > { %v259_v33 = vmul.f32 1.442695, %v258_v32 }
  0x70   : > { %471 = vpow2.f32 %v259_v33 }
  0x7d   : > { %v472_v34 = vpop.eup %471 }
  0x7e   : > { %v261_v35 = vsub.f32 1.0, %v472_v34 }
  0x80   : > { %v262_v36 = vmul.f32 %v261_v35, %v261_v35 }
  0x82   : > { %v263_v38 = vmul.f32 %v262_v36, %v257_v31 }
  0x84   : > { %v265_v39 = vadd.f32 %v264_v37, %v263_v38 }
  0x86   : > { %266 = vst [vmem:[#allocation2] sm:$0x3] %v265_v39 }
  0x8d   : > { %v270_v40 = vld [vmem:[#allocation2] sm:$0x3] }
  0x8e   : > { %v272_v41 = vsel %vm271_vm4, %v270_v40, 0.0 }
  0x8f   : > { %273 = vadd.xlane.f32.xlu0 %v272_v41 }
 0x118   : > { %v274_v42 = vpop.xlane.xlu0 %273 }
 0x119   : > { %v275_v43 = vrot.slane %v274_v42, 4 }
 0x11b   : > { %v276_v44 = vadd.f32 %v275_v43, %v274_v42 }
 0x11d   : > { %v277_v45 = vrot.slane %v276_v44, 2 }
 0x11f   : > { %v278_v46 = vadd.f32 %v277_v45, %v276_v44 }
 0x121   : > { %v279_v47 = vrot.slane %v278_v46, 1 }
 0x123   : > { %v280_v48 = vadd.f32 %v279_v47, %v278_v46 }
 0x125   : > { %396 = vpush %v280_v48 }
 0x156   : > { %s397_s18 = spop %396 }
 0x157   : > { %v282_v49 = vstv %s397_s18 }
 0x158   : > { %284 = vst.msk [vmem:[%s214_s17] sm:$0x1] %vm283_vm5, %v282_v49 }
 0x159 PF: > { %s18_s14 = sadd.s32 1, %s583_s14   ;;  %s739_s9 = smov %s567_s10 }
 0x15a   : > { %p15_p9 = scmp.ge.s32.totalorder %s18_s14, 4   ;;  %s740_s10 = smov %s571_s11 }
 0x15b   : > { %s741_s11 = smov %s654_s21  ;;  %s742_s12 = smov %s579_s13 }
 0x15c   : > { %s743_s13 = smov %s745_s16  ;;  %17 = sbr.rel (!%p15_p9) target bundleno = 6 (0x6), region = 92 }
 0x161   :  { %302 = vsyncpa [#allocation4], 1 }
 0x162   :  { %304 = vsyncpa [#allocation4 + $0x1], 1 }
 0x163   :  { %305 = vsyncpa [#allocation6], 1 }
 0x164   :  { %307 = vsyncpa [#allocation6 + $0x1], 1 }

</bundles_post_ra>
